<compile_context>
chip_gen: v7x
topology: tpu7x:2x2x1
jax: 0.10.0
libtpu: 0.0.40
codegen_flags: <defaults>
</compile_context>

<pallas_src>
import functools

import jax
import jax.numpy as jnp
from jax import lax
from jax.experimental import pallas as pl
from jax.experimental.pallas import tpu as pltpu

# Logical and lane-padded hidden widths (fixed by the Critic spec).
H1, H2 = 400, 300
H1P, H2P = 512, 384          # multiples of 128 -> unmasked vregs / clean MXU N
HTOT = H1P + H2P             # 896


def _round_up(x, m):
    return (x + m - 1) // m * m


def _bf16_elementwise_ok():
    """bf16 VALU exists on v6e/v7x; keep f32 elementwise on v5e and older."""
    try:
        kind = jax.devices()[0].device_kind.lower()
    except Exception:
        return False
    return ("v6" in kind) or ("v7" in kind)


def critic_kernel(xa_ref, w_in_ref, b_in_ref,
                  g1_ref, beta1_ref,
                  w2_ref, b2_ref, g2_ref, beta2_ref,
                  wq_ref, bq_ref, out_ref,
                  *, h1p, inv_h1, inv_h2, elem_dtype):
    eps = 1e-5
    cdt = elem_dtype

    # --- fused input matmul: [TILE_B, H1P+H2P] = [h1_pre | a_pre] -----------
    fused = jnp.dot(xa_ref[...], w_in_ref[...],
                    preferred_element_type=jnp.float32) + b_in_ref[...]
    h1 = fused[:, :h1p]        # [TILE_B, H1P]  (cols >= 400 are exactly zero)
    a = fused[:, h1p:]         # [TILE_B, H2P]  (cols >= 300 are exactly zero)

    # --- LayerNorm(400) + relu ----------------------------------------------
    # One-pass stats in f32.  Pad columns are exactly zero, so padded sums
    # equal the logical sums; the divisor stays 1/400 (NOT 1/512).
    s1 = jnp.sum(h1, axis=-1, keepdims=True)
    ss1 = jnp.sum(h1 * h1, axis=-1, keepdims=True)
    mu1 = s1 * inv_h1
    var1 = jnp.maximum(ss1 * inv_h1 - mu1 * mu1, 0.0)
    h1n = ((h1 - mu1) * lax.rsqrt(var1 + eps)).astype(cdt)
    # Affine + relu in elem dtype (bf16 on v6e/v7x, f32 on v5e).  gamma/beta
    # pad columns are zero, so pad activations stay exactly zero.
    h1c = jnp.maximum(
        h1n * g1_ref[...].astype(cdt) + beta1_ref[...].astype(cdt), 0.0)

    # --- fc2 -> LayerNorm(300) (no relu here, matches the PyTorch code) -----
    h2 = jnp.dot(h1c.astype(w2_ref.dtype), w2_ref[...],
                 preferred_element_type=jnp.float32) + b2_ref[...]
    s2 = jnp.sum(h2, axis=-1, keepdims=True)
    ss2 = jnp.sum(h2 * h2, axis=-1, keepdims=True)
    mu2 = s2 * inv_h2
    var2 = jnp.maximum(ss2 * inv_h2 - mu2 * mu2, 0.0)
    h2n = ((h2 - mu2) * lax.rsqrt(var2 + eps)).astype(cdt)
    h2c = h2n * g2_ref[...].astype(cdt) + beta2_ref[...].astype(cdt)

    # --- action branch relu, merge (elem dtype) ------------------------------
    a_relu = jnp.maximum(a, 0.0).astype(cdt)
    q_in = jnp.maximum(h2c + a_relu, 0.0)            # [TILE_B, H2P]

    # --- N=1 head on the MXU as a transposed-RHS matmul ----------------------
    # wq is packed as an (8, H2P) block (rows 1..7 zero) so M is MXU-friendly;
    # result row 0 is the lane-dense [1, TILE_B] q vector.
    qmat = lax.dot_general(wq_ref[...].astype(cdt), q_in,
                           dimension_numbers=(((1,), (1,)), ((), ())),
                           preferred_element_type=jnp.float32)
    out_ref[...] = qmat[0:1, :] + bq_ref[0]


@functools.partial(jax.jit, static_argnames=("tile_b", "use_bf16_elem"))
def _critic_forward_impl(state, action, kparams, tile_b, use_bf16_elem):
    B, n_obs = state.shape
    n_act = action.shape[1]
    KP = kparams["w_in"].shape[0]

    # Batch tiling: whole batch for tiny B; otherwise at least 2 grid steps
    # (so v7x's two TensorCores both get work), capped at tile_b rows/step.
    if B <= 16:
        TILE_B = B
    else:
        TILE_B = min(tile_b, _round_up((B + 1) // 2, 8))
    Bp = pl.cdiv(B, TILE_B) * TILE_B
    num_tiles = Bp // TILE_B

    # Fused, zero-padded input [state | action | 0...] built directly in bf16.
    xa = jnp.zeros((Bp, KP), jnp.bfloat16)
    xa = xa.at[:B, :n_obs].set(state.astype(jnp.bfloat16))
    xa = xa.at[:B, n_obs:n_obs + n_act].set(action.astype(jnp.bfloat16))

    elem_dtype = jnp.bfloat16 if use_bf16_elem else jnp.float32
    kern = functools.partial(critic_kernel, h1p=H1P,
                             inv_h1=1.0 / float(H1), inv_h2=1.0 / float(H2),
                             elem_dtype=elem_dtype)

    out = pl.pallas_call(
        kern,
        out_shape=jax.ShapeDtypeStruct((num_tiles, 1, TILE_B), jnp.float32),
        grid=(num_tiles,),
        in_specs=[
            pl.BlockSpec((TILE_B, KP), lambda i: (i, 0)),       # xa (tiled)
            pl.BlockSpec((KP, HTOT), lambda i: (0, 0)),         # w_in resident
            pl.BlockSpec((1, HTOT), lambda i: (0, 0)),          # b_in
            pl.BlockSpec((1, H1P), lambda i: (0, 0)),           # gamma1
            pl.BlockSpec((1, H1P), lambda i: (0, 0)),           # beta1
            pl.BlockSpec((H1P, H2P), lambda i: (0, 0)),         # w2 resident
            pl.BlockSpec((1, H2P), lambda i: (0, 0)),           # b2
            pl.BlockSpec((1, H2P), lambda i: (0, 0)),           # gamma2
            pl.BlockSpec((1, H2P), lambda i: (0, 0)),           # beta2
            pl.BlockSpec((8, H2P), lambda i: (0, 0)),           # wq block
            pl.BlockSpec(memory_space=pltpu.MemorySpace.SMEM),  # bq scalar
        ],
        # Lane-dense output: one [1, TILE_B] row per grid step.
        out_specs=pl.BlockSpec((None, 1, TILE_B), lambda i: (i, 0, 0)),
        compiler_params=pltpu.CompilerParams(
            dimension_semantics=("parallel",),
            vmem_limit_bytes=32 * 1024 * 1024),
    )(xa, kparams["w_in"], kparams["b_in"],
      kparams["g1"], kparams["beta1"],
      kparams["w2"], kparams["b2"], kparams["g2"], kparams["beta2"],
      kparams["wq_blk"], kparams["bq"])
    return out.reshape(-1)[:B].reshape(B, 1)


def critic_forward(state, action, kparams, tile_b=512):
    return _critic_forward_impl(state, action, kparams,
                                tile_b=tile_b,
                                use_bf16_elem=_bf16_elementwise_ok())


def init_critic_params(key, n_obs, n_actions):
    """Logical f32 params mirroring the PyTorch __init__ (shapes & ranges).

    Weights are stored transposed vs PyTorch, i.e. [in_features, out_features].
    """
    ks = jax.random.split(key, 8)

    def unif(k, shape, bound):
        return jax.random.uniform(k, shape, jnp.float32, -bound, bound)

    born1 = 1.0 / jnp.sqrt(jnp.float32(H1))      # 1/sqrt(weight.size(0)) = 1/sqrt(400)
    w1 = unif(ks[0], (n_obs, H1), born1)
    b1 = unif(ks[1], (1, H1), born1)
    born2 = 1.0 / jnp.sqrt(jnp.float32(H2))      # 1/sqrt(300)
    w2 = unif(ks[2], (H1, H2), born2)
    b2 = unif(ks[3], (1, H2), born2)
    born_a = 1.0 / jnp.sqrt(jnp.float32(n_actions))   # PyTorch default Linear init
    wa = unif(ks[4], (n_actions, H2), born_a)
    ba = unif(ks[5], (1, H2), born_a)
    wq = unif(ks[6], (H2, 1), 0.003)
    bq = unif(ks[7], (1, 1), 0.003)
    g1 = jnp.ones((1, H1), jnp.float32)
    beta1 = jnp.zeros((1, H1), jnp.float32)
    g2 = jnp.ones((1, H2), jnp.float32)
    beta2 = jnp.zeros((1, H2), jnp.float32)
    return dict(w1=w1, b1=b1, g1=g1, beta1=beta1,
                w2=w2, b2=b2, g2=g2, beta2=beta2,
                wa=wa, ba=ba, wq=wq, bq=bq)


def pack_critic_params(p, n_obs, n_actions):
    """Host-side packing: lane-pad, fuse block-diagonal input weight, bf16 cast.

    NOTE: pad columns of gamma/beta/biases/wq MUST stay zero -- the kernel's
    LayerNorm divisors and zero-pad invariance depend on it.
    """
    KP = _round_up(max(n_obs + n_actions, 8), 8)

    # Block-diagonal fused input weight [[W1, 0], [0, Wa]] -> [KP, HTOT].
    w_in = jnp.zeros((KP, HTOT), jnp.float32)
    w_in = w_in.at[:n_obs, :H1].set(p["w1"])
    w_in = w_in.at[n_obs:n_obs + n_actions, H1P:H1P + H2].set(p["wa"])
    b_in = jnp.zeros((1, HTOT), jnp.float32)
    b_in = b_in.at[:, :H1].set(p["b1"])
    b_in = b_in.at[:, H1P:H1P + H2].set(p["ba"])

    w2 = jnp.zeros((H1P, H2P), jnp.float32).at[:H1, :H2].set(p["w2"])
    b2 = jnp.zeros((1, H2P), jnp.float32).at[:, :H2].set(p["b2"])

    g1 = jnp.zeros((1, H1P), jnp.float32).at[:, :H1].set(p["g1"])
    beta1 = jnp.zeros((1, H1P), jnp.float32).at[:, :H1].set(p["beta1"])
    g2 = jnp.zeros((1, H2P), jnp.float32).at[:, :H2].set(p["g2"])
    beta2 = jnp.zeros((1, H2P), jnp.float32).at[:, :H2].set(p["beta2"])

    # q head weight as an (8, H2P) MXU-friendly block (only row 0 is real).
    wq_blk = jnp.zeros((8, H2P), jnp.float32).at[0, :H2].set(p["wq"][:, 0])
    bq = p["bq"].reshape(1).astype(jnp.float32)

    return dict(w_in=w_in.astype(jnp.bfloat16), b_in=b_in,
                g1=g1, beta1=beta1,
                w2=w2.astype(jnp.bfloat16), b2=b2, g2=g2, beta2=beta2,
                wq_blk=wq_blk, bq=bq)


def critic_reference(state, action, p):
    """Pure-JAX reference of the same forward pass (bf16 matmul inputs, f32 LN)."""
    eps = 1e-5

    def bdot(x, w):
        return jnp.dot(x.astype(jnp.bfloat16), w.astype(jnp.bfloat16),
                       preferred_element_type=jnp.float32)

    h1 = bdot(state, p["w1"]) + p["b1"]
    mu = h1.mean(-1, keepdims=True)
    var = ((h1 - mu) ** 2).mean(-1, keepdims=True)
    h1 = (h1 - mu) / jnp.sqrt(var + eps) * p["g1"] + p["beta1"]
    h1 = jnp.maximum(h1, 0.0)
    h2 = bdot(h1, p["w2"]) + p["b2"]
    mu = h2.mean(-1, keepdims=True)
    var = ((h2 - mu) ** 2).mean(-1, keepdims=True)
    h2 = (h2 - mu) / jnp.sqrt(var + eps) * p["g2"] + p["beta2"]
    a = jnp.maximum(bdot(action, p["wa"]) + p["ba"], 0.0)
    q_in = jnp.maximum(h2 + a, 0.0)
    return q_in @ p["wq"] + p["bq"]


if __name__ == "__main__":
    B, N_OBS, N_ACTIONS = 2, 8, 4
    key = jax.random.PRNGKey(0)
    k_state, k_action, k_params = jax.random.split(key, 3)

    state = jax.random.normal(k_state, (B, N_OBS), jnp.float32)
    action = jax.random.normal(k_action, (B, N_ACTIONS), jnp.float32)

    params = init_critic_params(k_params, N_OBS, N_ACTIONS)
    kparams = pack_critic_params(params, N_OBS, N_ACTIONS)

    q = critic_forward(state, action, kparams)
    q = jax.block_until_ready(q)

    q_ref = critic_reference(state, action, params)
    assert q.shape == (B, 1)
    # bf16 matmul inputs (f32 accumulation) on both sides; residual differences
    # come from one-pass vs two-pass LN stats, bf16 post-stat affine on
    # v6e/v7x, and the bf16 head matmul.
    assert jnp.allclose(q, q_ref, atol=5e-3, rtol=5e-3), (q, q_ref)

    print("KERNEL_OK")
</pallas_src>

<mosaic_0001>
module attributes {stable_mosaic.version = 11 : i64} {
  func.func @critic_kernel(%arg0: i32, %arg1: memref<2x16xbf16, #tpu.memory_space<vmem>>, %arg2: memref<16x896xbf16, #tpu.memory_space<vmem>>, %arg3: memref<1x896xf32, #tpu.memory_space<vmem>>, %arg4: memref<1x512xf32, #tpu.memory_space<vmem>>, %arg5: memref<1x512xf32, #tpu.memory_space<vmem>>, %arg6: memref<512x384xbf16, #tpu.memory_space<vmem>>, %arg7: memref<1x384xf32, #tpu.memory_space<vmem>>, %arg8: memref<1x384xf32, #tpu.memory_space<vmem>>, %arg9: memref<1x384xf32, #tpu.memory_space<vmem>>, %arg10: memref<8x384xf32, #tpu.memory_space<vmem>>, %arg11: memref<1xf32, #tpu.memory_space<smem>>, %arg12: memref<1x1x2xf32, #tpu.memory_space<vmem>>) attributes {dimension_semantics = [#tpu.dimension_semantics<parallel>], iteration_bounds = array<i64: 1>, scalar_prefetch = 0 : i64, scratch_operands = 0 : i64, tpu.core_type = #tpu.core_type<tc>, window_params = [{transform_indices = @transform_0, window_bounds = array<i64: 2, 16>}, {pipeline_mode = #tpu.pipeline_mode<synchronous>, transform_indices = @transform_1, window_bounds = array<i64: 16, 896>}, {pipeline_mode = #tpu.pipeline_mode<synchronous>, transform_indices = @transform_2, window_bounds = array<i64: 1, 896>}, {pipeline_mode = #tpu.pipeline_mode<synchronous>, transform_indices = @transform_3, window_bounds = array<i64: 1, 512>}, {pipeline_mode = #tpu.pipeline_mode<synchronous>, transform_indices = @transform_4, window_bounds = array<i64: 1, 512>}, {pipeline_mode = #tpu.pipeline_mode<synchronous>, transform_indices = @transform_5, window_bounds = array<i64: 512, 384>}, {pipeline_mode = #tpu.pipeline_mode<synchronous>, transform_indices = @transform_6, window_bounds = array<i64: 1, 384>}, {pipeline_mode = #tpu.pipeline_mode<synchronous>, transform_indices = @transform_7, window_bounds = array<i64: 1, 384>}, {pipeline_mode = #tpu.pipeline_mode<synchronous>, transform_indices = @transform_8, window_bounds = array<i64: 1, 384>}, {pipeline_mode = #tpu.pipeline_mode<synchronous>, transform_indices = @transform_9, window_bounds = array<i64: 8, 384>}, {transform_indices = @transform_10, window_bounds = array<i64: 1>}, {transform_indices = @transform_11, window_bounds = array<i64: 1, 1, 2>}]} {
    %c0 = arith.constant 0 : index
    %c0_0 = arith.constant 0 : index
    %0 = vector.load %arg1[%c0, %c0_0] : memref<2x16xbf16, #tpu.memory_space<vmem>>, vector<2x16xbf16>
    %c0_1 = arith.constant 0 : index
    %c0_2 = arith.constant 0 : index
    %1 = vector.load %arg2[%c0_1, %c0_2] : memref<16x896xbf16, #tpu.memory_space<vmem>>, vector<16x896xbf16>
    %cst = arith.constant dense<0.000000e+00> : vector<2x896xf32>
    %2 = tpu.matmul %0, %1, %cst {dimension_numbers = #tpu.dot_dimension_numbers<[1], [0], [0], [1], [0, 0, 1, 1], [], []>} : vector<2x16xbf16>, vector<16x896xbf16>, vector<2x896xf32> -> vector<2x896xf32>
    %c0_3 = arith.constant 0 : index
    %c0_4 = arith.constant 0 : index
    %3 = vector.load %arg3[%c0_3, %c0_4] : memref<1x896xf32, #tpu.memory_space<vmem>>, vector<1x896xf32>
    %4 = vector.broadcast %3 : vector<1x896xf32> to vector<2x896xf32>
    %5 = arith.addf %2, %4 : vector<2x896xf32>
    %6 = vector.extract_strided_slice %5 {offsets = [0, 0], sizes = [2, 512], strides = [1, 1]} : vector<2x896xf32> to vector<2x512xf32>
    %7 = vector.extract_strided_slice %5 {offsets = [0, 512], sizes = [2, 384], strides = [1, 1]} : vector<2x896xf32> to vector<2x384xf32>
    %cst_5 = arith.constant dense<0.000000e+00> : vector<2xf32>
    %8 = vector.multi_reduction <add>, %6, %cst_5 [1] : vector<2x512xf32> to vector<2xf32>
    %9 = vector.shape_cast %8 : vector<2xf32> to vector<2x1xf32>
    %10 = arith.mulf %6, %6 : vector<2x512xf32>
    %cst_6 = arith.constant dense<0.000000e+00> : vector<2xf32>
    %11 = vector.multi_reduction <add>, %10, %cst_6 [1] : vector<2x512xf32> to vector<2xf32>
    %12 = vector.shape_cast %11 : vector<2xf32> to vector<2x1xf32>
    %cst_7 = arith.constant 2.500000e-03 : f32
    %13 = vector.broadcast %cst_7 : f32 to vector<2x1xf32>
    %14 = arith.mulf %9, %13 : vector<2x1xf32>
    %cst_8 = arith.constant 2.500000e-03 : f32
    %15 = vector.broadcast %cst_8 : f32 to vector<2x1xf32>
    %16 = arith.mulf %12, %15 : vector<2x1xf32>
    %17 = arith.mulf %14, %14 : vector<2x1xf32>
    %18 = arith.subf %16, %17 : vector<2x1xf32>
    %cst_9 = arith.constant 0.000000e+00 : f32
    %19 = vector.broadcast %cst_9 : f32 to vector<2x1xf32>
    %20 = arith.maximumf %18, %19 : vector<2x1xf32>
    %21 = vector.broadcast %14 : vector<2x1xf32> to vector<2x512xf32>
    %22 = arith.subf %6, %21 : vector<2x512xf32>
    %cst_10 = arith.constant 9.99999974E-6 : f32
    %23 = vector.broadcast %cst_10 : f32 to vector<2x1xf32>
    %24 = arith.addf %20, %23 : vector<2x1xf32>
    %25 = math.rsqrt %24 : vector<2x1xf32>
    %26 = vector.broadcast %25 : vector<2x1xf32> to vector<2x512xf32>
    %27 = arith.mulf %22, %26 : vector<2x512xf32>
    %c0_11 = arith.constant 0 : index
    %c0_12 = arith.constant 0 : index
    %28 = vector.load %arg4[%c0_11, %c0_12] : memref<1x512xf32, #tpu.memory_space<vmem>>, vector<1x512xf32>
    %29 = vector.broadcast %28 : vector<1x512xf32> to vector<2x512xf32>
    %30 = arith.mulf %27, %29 : vector<2x512xf32>
    %c0_13 = arith.constant 0 : index
    %c0_14 = arith.constant 0 : index
    %31 = vector.load %arg5[%c0_13, %c0_14] : memref<1x512xf32, #tpu.memory_space<vmem>>, vector<1x512xf32>
    %32 = vector.broadcast %31 : vector<1x512xf32> to vector<2x512xf32>
    %33 = arith.addf %30, %32 : vector<2x512xf32>
    %cst_15 = arith.constant 0.000000e+00 : f32
    %34 = vector.broadcast %cst_15 : f32 to vector<2x512xf32>
    %35 = arith.maximumf %33, %34 : vector<2x512xf32>
    %36 = arith.truncf %35 : vector<2x512xf32> to vector<2x512xbf16>
    %c0_16 = arith.constant 0 : index
    %c0_17 = arith.constant 0 : index
    %37 = vector.load %arg6[%c0_16, %c0_17] : memref<512x384xbf16, #tpu.memory_space<vmem>>, vector<512x384xbf16>
    %cst_18 = arith.constant dense<0.000000e+00> : vector<2x384xf32>
    %38 = tpu.matmul %36, %37, %cst_18 {dimension_numbers = #tpu.dot_dimension_numbers<[1], [0], [0], [1], [0, 0, 1, 1], [], []>} : vector<2x512xbf16>, vector<512x384xbf16>, vector<2x384xf32> -> vector<2x384xf32>
    %c0_19 = arith.constant 0 : index
    %c0_20 = arith.constant 0 : index
    %39 = vector.load %arg7[%c0_19, %c0_20] : memref<1x384xf32, #tpu.memory_space<vmem>>, vector<1x384xf32>
    %40 = vector.broadcast %39 : vector<1x384xf32> to vector<2x384xf32>
    %41 = arith.addf %38, %40 : vector<2x384xf32>
    %cst_21 = arith.constant dense<0.000000e+00> : vector<2xf32>
    %42 = vector.multi_reduction <add>, %41, %cst_21 [1] : vector<2x384xf32> to vector<2xf32>
    %43 = vector.shape_cast %42 : vector<2xf32> to vector<2x1xf32>
    %44 = arith.mulf %41, %41 : vector<2x384xf32>
    %cst_22 = arith.constant dense<0.000000e+00> : vector<2xf32>
    %45 = vector.multi_reduction <add>, %44, %cst_22 [1] : vector<2x384xf32> to vector<2xf32>
    %46 = vector.shape_cast %45 : vector<2xf32> to vector<2x1xf32>
    %cst_23 = arith.constant 0.00333333341 : f32
    %47 = vector.broadcast %cst_23 : f32 to vector<2x1xf32>
    %48 = arith.mulf %43, %47 : vector<2x1xf32>
    %cst_24 = arith.constant 0.00333333341 : f32
    %49 = vector.broadcast %cst_24 : f32 to vector<2x1xf32>
    %50 = arith.mulf %46, %49 : vector<2x1xf32>
    %51 = arith.mulf %48, %48 : vector<2x1xf32>
    %52 = arith.subf %50, %51 : vector<2x1xf32>
    %cst_25 = arith.constant 0.000000e+00 : f32
    %53 = vector.broadcast %cst_25 : f32 to vector<2x1xf32>
    %54 = arith.maximumf %52, %53 : vector<2x1xf32>
    %55 = vector.broadcast %48 : vector<2x1xf32> to vector<2x384xf32>
    %56 = arith.subf %41, %55 : vector<2x384xf32>
    %cst_26 = arith.constant 9.99999974E-6 : f32
    %57 = vector.broadcast %cst_26 : f32 to vector<2x1xf32>
    %58 = arith.addf %54, %57 : vector<2x1xf32>
    %59 = math.rsqrt %58 : vector<2x1xf32>
    %60 = vector.broadcast %59 : vector<2x1xf32> to vector<2x384xf32>
    %61 = arith.mulf %56, %60 : vector<2x384xf32>
    %c0_27 = arith.constant 0 : index
    %c0_28 = arith.constant 0 : index
    %62 = vector.load %arg8[%c0_27, %c0_28] : memref<1x384xf32, #tpu.memory_space<vmem>>, vector<1x384xf32>
    %63 = vector.broadcast %62 : vector<1x384xf32> to vector<2x384xf32>
    %64 = arith.mulf %61, %63 : vector<2x384xf32>
    %c0_29 = arith.constant 0 : index
    %c0_30 = arith.constant 0 : index
    %65 = vector.load %arg9[%c0_29, %c0_30] : memref<1x384xf32, #tpu.memory_space<vmem>>, vector<1x384xf32>
    %66 = vector.broadcast %65 : vector<1x384xf32> to vector<2x384xf32>
    %67 = arith.addf %64, %66 : vector<2x384xf32>
    %cst_31 = arith.constant 0.000000e+00 : f32
    %68 = vector.broadcast %cst_31 : f32 to vector<2x384xf32>
    %69 = arith.maximumf %7, %68 : vector<2x384xf32>
    %70 = arith.addf %67, %69 : vector<2x384xf32>
    %cst_32 = arith.constant 0.000000e+00 : f32
    %71 = vector.broadcast %cst_32 : f32 to vector<2x384xf32>
    %72 = arith.maximumf %70, %71 : vector<2x384xf32>
    %c0_33 = arith.constant 0 : index
    %c0_34 = arith.constant 0 : index
    %73 = vector.load %arg10[%c0_33, %c0_34] : memref<8x384xf32, #tpu.memory_space<vmem>>, vector<8x384xf32>
    %cst_35 = arith.constant dense<0.000000e+00> : vector<8x2xf32>
    %74 = tpu.matmul %73, %72, %cst_35 {dimension_numbers = #tpu.dot_dimension_numbers<[1], [1], [0], [0], [0, 0, 1, 0], [], []>} : vector<8x384xf32>, vector<2x384xf32>, vector<8x2xf32> -> vector<8x2xf32>
    %75 = vector.extract_strided_slice %74 {offsets = [0, 0], sizes = [1, 2], strides = [1, 1]} : vector<8x2xf32> to vector<1x2xf32>
    %c0_36 = arith.constant 0 : index
    %76 = memref.load %arg11[%c0_36] : memref<1xf32, #tpu.memory_space<smem>>
    %77 = vector.broadcast %76 : f32 to vector<1x2xf32>
    %78 = arith.addf %75, %77 : vector<1x2xf32>
    %c0_37 = arith.constant 0 : index
    %c0_38 = arith.constant 0 : index
    %c0_39 = arith.constant 0 : index
    %79 = vector.load %arg12[%c0_37, %c0_38, %c0_39] : memref<1x1x2xf32, #tpu.memory_space<vmem>>, vector<1x1x2xf32>
    %80 = vector.shape_cast %79 : vector<1x1x2xf32> to vector<1x2xf32>
    %81 = vector.shape_cast %78 : vector<1x2xf32> to vector<1x1x2xf32>
    tpu.vector_store %arg12[%c0_37, %c0_38, %c0_39], %81 {strides = array<i32>} : memref<1x1x2xf32, #tpu.memory_space<vmem>>, vector<1x1x2xf32>,
    return
  }
  func.func @transform_0(%arg0: i32) -> (i32, i32) {
    %c0_i32 = arith.constant 0 : i32
    %c0_i32_0 = arith.constant 0 : i32
    return %arg0, %c0_i32 : i32, i32
  }
  func.func @transform_1(%arg0: i32) -> (i32, i32) {
    %c0_i32 = arith.constant 0 : i32
    %c0_i32_0 = arith.constant 0 : i32
    %c0_i32_1 = arith.constant 0 : i32
    return %c0_i32, %c0_i32_0 : i32, i32
  }
  func.func @transform_2(%arg0: i32) -> (i32, i32) {
    %c0_i32 = arith.constant 0 : i32
    %c0_i32_0 = arith.constant 0 : i32
    %c0_i32_1 = arith.constant 0 : i32
    return %c0_i32, %c0_i32_0 : i32, i32
  }
  func.func @transform_3(%arg0: i32) -> (i32, i32) {
    %c0_i32 = arith.constant 0 : i32
    %c0_i32_0 = arith.constant 0 : i32
    %c0_i32_1 = arith.constant 0 : i32
    return %c0_i32, %c0_i32_0 : i32, i32
  }
  func.func @transform_4(%arg0: i32) -> (i32, i32) {
    %c0_i32 = arith.constant 0 : i32
    %c0_i32_0 = arith.constant 0 : i32
    %c0_i32_1 = arith.constant 0 : i32
    return %c0_i32, %c0_i32_0 : i32, i32
  }
  func.func @transform_5(%arg0: i32) -> (i32, i32) {
    %c0_i32 = arith.constant 0 : i32
    %c0_i32_0 = arith.constant 0 : i32
    %c0_i32_1 = arith.constant 0 : i32
    return %c0_i32, %c0_i32_0 : i32, i32
  }
  func.func @transform_6(%arg0: i32) -> (i32, i32) {
    %c0_i32 = arith.constant 0 : i32
    %c0_i32_0 = arith.constant 0 : i32
    %c0_i32_1 = arith.constant 0 : i32
    return %c0_i32, %c0_i32_0 : i32, i32
  }
  func.func @transform_7(%arg0: i32) -> (i32, i32) {
    %c0_i32 = arith.constant 0 : i32
    %c0_i32_0 = arith.constant 0 : i32
    %c0_i32_1 = arith.constant 0 : i32
    return %c0_i32, %c0_i32_0 : i32, i32
  }
  func.func @transform_8(%arg0: i32) -> (i32, i32) {
    %c0_i32 = arith.constant 0 : i32
    %c0_i32_0 = arith.constant 0 : i32
    %c0_i32_1 = arith.constant 0 : i32
    return %c0_i32, %c0_i32_0 : i32, i32
  }
  func.func @transform_9(%arg0: i32) -> (i32, i32) {
    %c0_i32 = arith.constant 0 : i32
    %c0_i32_0 = arith.constant 0 : i32
    %c0_i32_1 = arith.constant 0 : i32
    return %c0_i32, %c0_i32_0 : i32, i32
  }
  func.func @transform_10(%arg0: i32) -> i32 {
    %c0_i32 = arith.constant 0 : i32
    %c0_i32_0 = arith.constant 0 : i32
    return %c0_i32 : i32
  }
  func.func @transform_11(%arg0: i32) -> (i32, i32, i32) {
    %c0_i32 = arith.constant 0 : i32
    %c0_i32_0 = arith.constant 0 : i32
    %c0_i32_1 = arith.constant 0 : i32
    return %arg0, %c0_i32, %c0_i32_0 : i32, i32, i32
  }
}

</mosaic_0001>

<bundles_post_ra>
// kernel: _critic_forward_impl.1
= control target key start
LH: loop header
LB: loop body
LE: loop exit
PB: predicated region body
PF: predicated region fallthrough
CT: control target
= control target key end

     0   :  { %17 = vsyncpa [#allocation4], 0  ;;  %s2187_s0 = inlined_call_operand.vmem [shape: bf16[2,16], index: 0, kind: input, shape index: {}]   ;;  %s2188_s1 = inlined_call_operand.hbm [shape: bf16[16,896], index: 1, kind: input, shape index: {}]   ;;  %s2189_s2 = inlined_call_operand.vmem [shape: f32[1,896], index: 2, kind: input, shape index: {}]   ;;  %s2190_s3 = inlined_call_operand.vmem [shape: f32[1,512], index: 3, kind: input, shape index: {}]   ;;  %s2191_s4 = inlined_call_operand.vmem [shape: f32[1,512], index: 4, kind: input, shape index: {}]   ;;  %s2192_s5 = inlined_call_operand.hbm [shape: bf16[512,384], index: 5, kind: input, shape index: {}]   ;;  %s2193_s6 = inlined_call_operand.vmem [shape: f32[1,384], index: 6, kind: input, shape index: {}]   ;;  %s2194_s7 = inlined_call_operand.hbm [shape: f32[1,384], index: 7, kind: input, shape index: {}]   ;;  %s2195_s8 = inlined_call_operand.vmem [shape: f32[1,384], index: 8, kind: input, shape index: {}]   ;;  %s2196_s9 = inlined_call_operand.vmem [shape: f32[8,384], index: 9, kind: input, shape index: {}]   ;;  %s2197_s10 = inlined_call_operand.<no memory space> [shape: f32[1], index: 10, kind: input, shape index: {}]   ;;  %s2198_s11 = inlined_call_operand.hbm [shape: f32[1,1,2], index: 11, kind: output, shape index: {}]  }
   0x1   :  { %18 = vsyncpa [#allocation7], 0 }
   0x2   :  { %19 = vsyncpa [#allocation5], 0  ;;  %s1908_s17 = smov [#allocation6]   ;;  %s1814_s21 = scalar_lea.hbm %s2192_s5, 12288 }
   0x3   :  { %s45_s18 = sshll.u32 %s1908_s17, 4  ;;  %p1815_p0 = scmp.ne.s32.totalorder %s2192_s5, %s1814_s21  ;;  %s46_s18 = int_to_ptr.vmem [resolvable:$true] %s45_s18 }
   0x4   :  { %p1818_p1 = scmp.lt.u32.totalorder %s1814_s21, %s2192_s5 }
   0x6   :  { %p1820_p2 = pnand %p1818_p1, %p1815_p0 }
   0x8   :  { %1823 = shalt.err (!%p1820_p2)
}
   0x9   :  { %s1824_s26 = scalar_lea.vmem %s46_s18, 12288  ;;  %p1829_p4 = scmp.lt.s32.totalorder %s46_s18, %s46_s18 }
   0xa   :  { %p1825_p3 = scmp.ne.s32.totalorder %s46_s18, %s1824_s26  ;;  %p1830_p5 = scmp.lt.s32.totalorder %s1824_s26, %s1824_s26 }
   0xc   :  { %p1831_p6 = por %p1830_p5, %p1829_p4 }
   0xe   :  { %p1832_p7 = pnand %p1831_p6, %p1825_p3 }
  0x10   :  { %1835 = shalt.err (!%p1832_p7)
}
  0x11   :  { %s1909_s27 = smov 192   ;;  %s1910_s28 = smov 12  }
  0x12   :  { %51 = dma.hbm_to_vmem [thread:$0]  %s2192_s5, 12288, %s46_s18, [#allocation7], %s1909_s27, %s1909_s27, %s1910_s28  }
  0x13   :  { %s1911_s12 = smov [#allocation3]   ;;  %s1836_s16 = scalar_lea.hbm %s2188_s1, 896 }
  0x14   :  { %s27_s13 = sshll.u32 %s1911_s12, 4  ;;  %p1837_p8 = scmp.ne.s32.totalorder %s2188_s1, %s1836_s16  ;;  %s28_s13 = int_to_ptr.vmem [resolvable:$true] %s27_s13 }
  0x15   :  { %p1840_p9 = scmp.lt.u32.totalorder %s1836_s16, %s2188_s1 }
  0x17   :  { %p1842_p10 = pnand %p1840_p9, %p1837_p8 }
  0x19   :  { %1845 = shalt.err (!%p1842_p10)
}
  0x1a   :  { %s1846_s22 = scalar_lea.vmem %s28_s13, 896  ;;  %p1851_p12 = scmp.lt.s32.totalorder %s28_s13, %s28_s13 }
  0x1b   :  { %p1847_p11 = scmp.ne.s32.totalorder %s28_s13, %s1846_s22  ;;  %p1852_p13 = scmp.lt.s32.totalorder %s1846_s22, %s1846_s22 }
  0x1d   :  { %p1853_p0 = por %p1852_p13, %p1851_p12 }
  0x1f   :  { %p1854_p1 = pnand %p1853_p0, %p1847_p11 }
  0x21   :  { %1857 = shalt.err (!%p1854_p1)
}
  0x22   :  { %s1912_s5 = smov 448   ;;  %s1913_s18 = smov 28  }
  0x23   :  { %33 = dma.hbm_to_vmem [thread:$0]  %s2188_s1, 896, %s28_s13, [#allocation4], %s1912_s5, %s1912_s5, %s1913_s18  }
  0x24   :  { %s1914_s25 = smov [#allocation8]   ;;  %s1858_s29 = scalar_lea.hbm %s2194_s7, 48 }
  0x25   :  { %s60_s26 = sshll.u32 %s1914_s25, 4  ;;  %p1859_p2 = scmp.ne.s32.totalorder %s2194_s7, %s1858_s29  ;;  %s61_s26 = int_to_ptr.vmem [resolvable:$true] %s60_s26 }
  0x26   :  { %p1862_p3 = scmp.lt.u32.totalorder %s1858_s29, %s2194_s7 }
  0x28   :  { %p1864_p4 = pnand %p1862_p3, %p1859_p2 }
  0x2a   :  { %1867 = shalt.err (!%p1864_p4)
}
  0x2b   :  { %s1868_s16 = scalar_lea.vmem %s61_s26, 48  ;;  %s1872_s1 = scalar_lea.vmem %s61_s26, 64 }
  0x2c   :  { %p1869_p5 = scmp.ne.s32.totalorder %s61_s26, %s1868_s16  ;;  %p1873_p6 = scmp.lt.s32.totalorder %s61_s26, %s61_s26 }
  0x2d   :  { %p1874_p7 = scmp.lt.s32.totalorder %s1872_s1, %s1868_s16 }
  0x2f   :  { %p1875_p8 = por %p1874_p7, %p1873_p6 }
  0x31   :  { %p1876_p9 = pnand %p1875_p8, %p1869_p5 }
  0x33   :  { %1879 = shalt.err (!%p1876_p9)
}
  0x34   :  { %63 = dma.hbm_to_vmem [thread:$0]  %s2194_s7, 48, %s61_s26, [#allocation7]  }
  0x35   :  { %1902 = dma.done.wait [#allocation4], 896  }
  0x36   :  { %1903 = vsyncadd [#allocation4], 4294966400 }
  0x37   :  { %1904 = dma.done.wait [#allocation7], 12336  }
  0x38   :  { %1905 = vsyncadd [#allocation7], 4294954960  ;;  %v1915_v0 = vmov 0   ;;  %v1672_v1 = vld [vmem:[#allocation3 + $0x4] ss:$28 sps:$4 sm:$0xff]   ;;  %vm162_vm0 = vcmask 130048   ;;  %v91_v26 = vlaneseq }
  0x39   :  { %198 = vmatprep.mubr.bf16.mxu1 %v1915_v0  ;;  %v1674_v2 = vld [vmem:[#allocation3] ss:$28 sps:$4 sm:$0xff]   ;;  %166 = vmatprep.subr.bf16.mxu1 %v1672_v1  ;;  %v1677_v4 = vld [vmem:[#allocation3 + $0xc] ss:$28 sps:$4 sm:$0xff]   ;;  %v1680_v7 = vld [vmem:[#allocation6] ss:$12 sps:$4 sm:$0xff]  }
  0x3a   :  { %v2018_v3 = vld [vmem:[%s2187_s0] sm:$0x1]  ;;  %167 = vmatpush1.bf16.msra.mxu1 %v1674_v2  ;;  %v1675_v5 = vld [vmem:[#allocation3 + $0x8] ss:$28 sps:$4 sm:$0xff]   ;;  %v1683_v9 = vld [vmem:[#allocation6 + $0x18] ss:$12 sps:$4 sm:$0xff]  }
  0x3b   :  { %207 = vmatprep.subr.bf16.mxu1 %v1677_v4  ;;  %v1678_v6 = vld [vmem:[#allocation6 + $0x4] ss:$12 sps:$4 sm:$0xff]   ;;  %v1681_v8 = vld [vmem:[#allocation6 + $0x1c] ss:$12 sps:$4 sm:$0xff]   ;;  %v1695_v10 = vld [vmem:[#allocation3 + $0x10] ss:$28 sps:$4 sm:$0xff]  }
  0x3c   :  { %1084 = vmatprep.subr.bf16.mxu0 %v1678_v6  ;;  %v1684_v11 = vld [vmem:[#allocation6 + $0x34] ss:$12 sps:$4 sm:$0xff]   ;;  %v1697_v12 = vld [vmem:[#allocation3 + $0x14] ss:$28 sps:$4 sm:$0xff]   ;;  %v1916_v16 = vmov 0.0   ;;  %v2027_v27 = vshrl.u32 %v91_v26, 7 }
  0x3d   :  { %1496 = vmatmul.mubr.msk.bf16.vlgmr.msra.gmra.mrb[0].mxu1 %vm162_vm0, %v2018_v3  ;;  %1085 = vmatpush1.bf16.msra.mxu0 %v1680_v7  ;;  %v1686_v13 = vld [vmem:[#allocation6 + $0x30] ss:$12 sps:$4 sm:$0xff]   ;;  %v1687_v15 = vld [vmem:[#allocation6 + $0x4c] ss:$12 sps:$4 sm:$0xff]   ;;  %v1689_v17 = vld [vmem:[#allocation6 + $0x48] ss:$12 sps:$4 sm:$0xff]  }
  0x3e   :  { %208 = vmatpush1.bf16.msra.mxu1 %v1675_v5  ;;  %239 = vmatprep.mubr.bf16.mxu1 %v1915_v0  ;;  %v1704_v14 = vld [vmem:[#allocation3 + $0x18] ss:$28 sps:$4 sm:$0xff]   ;;  %v1690_v18 = vld [vmem:[#allocation6 + $0x64] ss:$12 sps:$4 sm:$0xff]   ;;  %v1702_v24 = vld [vmem:[#allocation6 + $0xac] ss:$12 sps:$4 sm:$0xff]  }
  0x3f   :  { %1086 = vmatprep.subr.bf16.mxu0 %v1681_v8  ;;  %248 = vmatprep.subr.bf16.mxu1 %v1697_v12  ;;  %v1692_v19 = vld [vmem:[#allocation6 + $0x60] ss:$12 sps:$4 sm:$0xff]   ;;  %v1693_v20 = vld [vmem:[#allocation6 + $0x7c] ss:$12 sps:$4 sm:$0xff]   ;;  %v1698_v21 = vld [vmem:[#allocation6 + $0x78] ss:$12 sps:$4 sm:$0xff]  }
  0x40   :  { %v1699_v22 = vld [vmem:[#allocation6 + $0x94] ss:$12 sps:$4 sm:$0xff]   ;;  %v1701_v23 = vld [vmem:[#allocation6 + $0x90] ss:$12 sps:$4 sm:$0xff]   ;;  %v2030_v28 = vsub.s32 0, %v2027_v27  ;;  %v2035_v29 = vld [vmem:[%s2189_s2] sm:$0xff] }
  0x41   :  { %1087 = vmatpush1.bf16.msra.mxu0 %v1683_v9  ;;  %v1705_v25 = vld [vmem:[#allocation6 + $0xa8] ss:$12 sps:$4 sm:$0xff]   ;;  %v2038_v30 = vsub.s32 1, %v2027_v27  ;;  %v2047_v36 = vsub.s32 2, %v2027_v27  ;;  %v2052_v39 = vsub.s32 3, %v2027_v27  ;;  %vm329_vm1 = vcmask 1041408  }
  0x42   :  { %1088 = vmatprep.subr.bf16.mxu0 %v1684_v11  ;;  %v94_v31 = vrot.slane %v2035_v29, %v2030_v28  ;;  %v1706_v4 = vld [vmem:[#allocation6 + $0xc4] ss:$12 sps:$4 sm:$0xff]   ;;  %v1708_v5 = vld [vmem:[#allocation6 + $0xc8] ss:$12 sps:$4 sm:$0xff]   ;;  %v1709_v6 = vld [vmem:[#allocation6 + $0xc0] ss:$12 sps:$4 sm:$0xff]  }
  0x43   :  { %v98_v32 = vrot.slane %v2035_v29, %v2038_v30  ;;  %v102_v43 = vrot.slane %v2035_v29, %v2047_v36  ;;  %v106_v44 = vrot.slane %v2035_v29, %v2052_v39  ;;  %v1710_v7 = vld [vmem:[#allocation6 + $0x8] ss:$12 sps:$4 sm:$0xff]   ;;  %vm1917_vm2 = vmmov 0   ;;  %v1713_v9 = vld [vmem:[#allocation6 + $0xe0] ss:$12 sps:$4 sm:$0xff]   ;;  %s1918_s30 = smov [#allocation9]  }
  0x44   :  { %v1711_v8 = vld [vmem:[#allocation6 + $0xdc] ss:$12 sps:$4 sm:$0xff]   ;;  %v1715_v11 = vld [vmem:[#allocation6 + $0x20] ss:$12 sps:$4 sm:$0xff]   ;;  %v1734_v26 = vld [vmem:[#allocation6 + $0x138] ss:$12 sps:$4 sm:$0xff]  }
  0x45   :  { %1497 = vmatmul.mubr.msk.bf16.vlgmr.msra.gmra.mrb[4].mxu1 %vm162_vm0, %v2018_v3  ;;  %1089 = vmatpush1.bf16.msra.mxu0 %v1686_v13  ;;  %v1716_v12 = vld [vmem:[#allocation6 + $0xf4] ss:$12 sps:$4 sm:$0xff]   ;;  %v1718_v13 = vld [vmem:[#allocation6 + $0xf8] ss:$12 sps:$4 sm:$0xff]   ;;  %s1479_s12 = sshll.u32 %s1918_s30, 4  ;;  %vm1471_vm3 = vcmask 8192   ;;  %s1480_s12 = int_to_ptr.vmem [resolvable:$true] %s1479_s12 }
  0x46   :  { %280 = vmatprep.mubr.bf16.mxu1 %v1915_v0  ;;  %249 = vmatpush1.bf16.msra.mxu1 %v1695_v10  ;;  %v1714_v10 = vld [vmem:[#allocation6 + $0xd8] ss:$12 sps:$4 sm:$0xff]   ;;  %s1880_s14 = scalar_lea.vmem %s1480_s12, 16  ;;  %s1884_s15 = scalar_lea.vmem %s1480_s12, 32 }
  0x47   :  { %1644 = vmatprep.subr.bf16.mxu1 %v1916_v16  ;;  %1090 = vmatprep.subr.bf16.mxu0 %v1687_v15  ;;  %v1720_v15 = vld [vmem:[#allocation6 + $0x38] ss:$12 sps:$4 sm:$0xff]   ;;  %p1881_p10 = scmp.ne.s32.totalorder %s1480_s12, %s1880_s14  ;;  %p1885_p11 = scmp.lt.s32.totalorder %s1480_s12, %s1480_s12 }
  0x48   :  { %p1886_p12 = scmp.lt.s32.totalorder %s1884_s15, %s1880_s14 }
  0x49   :  { %1091 = vmatpush1.bf16.msra.mxu0 %v1689_v17  ;;  %v1721_v17 = vld [vmem:[#allocation6 + $0x10c] ss:$12 sps:$4 sm:$0xff]  }
  0x4a   :  { %1092 = vmatprep.subr.bf16.mxu0 %v1690_v18  ;;  %v1724_v18 = vld [vmem:[#allocation6 + $0x108] ss:$12 sps:$4 sm:$0xff]   ;;  %p1887_p13 = por %p1886_p12, %p1885_p11 }
  0x4c   :  { %p1888_p0 = pnand %p1887_p13, %p1881_p10 }
  0x4d   :  { %1498 = vmatmul.mubr.msk.bf16.vlgmr.msra.gmra.mrb[8].mxu1 %vm162_vm0, %v2018_v3  ;;  %1093 = vmatpush1.bf16.msra.mxu0 %v1692_v19  ;;  %v1725_v19 = vld [vmem:[#allocation6 + $0x50] ss:$12 sps:$4 sm:$0xff]  }
  0x4e   :  { %1645 = vmatpush3.bf16.msra.mxu1 %v1704_v14  ;;  %1094 = vmatprep.subr.bf16.mxu0 %v1693_v20  ;;  %v1719_v14 = vld [vmem:[#allocation6 + $0xf0] ss:$12 sps:$4 sm:$0xff]  }
  0x4f   :  { %1646 = vmatprep.mubr.msk.bf16.mxu1 %vm1917_vm2, %v1916_v16  ;;  %1598 = vmatprep.subr.bf16.mxu1 %v1708_v5  ;;  %v1726_v20 = vld [vmem:[#allocation6 + $0x124] ss:$12 sps:$4 sm:$0xff]  }
  0x51   :  { %1095 = vmatpush1.bf16.msra.mxu0 %v1698_v21  ;;  %v1728_v21 = vld [vmem:[#allocation6 + $0x128] ss:$12 sps:$4 sm:$0xff]  }
  0x52   :  { %1096 = vmatprep.subr.bf16.mxu0 %v1699_v22  ;;  %v1729_v22 = vld [vmem:[#allocation6 + $0x120] ss:$12 sps:$4 sm:$0xff]  }
  0x55   :  { %1097 = vmatpush1.bf16.msra.mxu0 %v1701_v23  ;;  %1647 = vmatmul.mubr.msk.bf16.vlgmr.msra.gmra.mrb[12].mxu1 %vm162_vm0, %v2018_v3  ;;  %v1723_v3 = vld [vmem:[#allocation6 + $0x110] ss:$12 sps:$4 sm:$0xff]   ;;  %v1730_v23 = vld [vmem:[#allocation6 + $0x68] ss:$12 sps:$4 sm:$0xff]  }
  0x56   :  { %1098 = vmatprep.subr.bf16.mxu0 %v1702_v24  ;;  %1599 = vmatpush3.bf16.msra.mxu1 %v1710_v7  ;;  %v1731_v24 = vld [vmem:[#allocation6 + $0x13c] ss:$12 sps:$4 sm:$0xff]  }
  0x57   :  { %1600 = vmatprep.subr.bf16.mxu1 %v1713_v9 }
  0x59   :  { %1099 = vmatpush1.bf16.msra.mxu0 %v1705_v25  ;;  %v1733_v25 = vld [vmem:[#allocation6 + $0x140] ss:$12 sps:$4 sm:$0xff]  }
  0x5a   :  { %1100 = vmatprep.subr.bf16.mxu0 %v1706_v4  ;;  %1601 = vmatpush3.bf16.msra.mxu1 %v1715_v11 }
  0x5b   :  { %1602 = vmatprep.subr.bf16.mxu1 %v1718_v13 }
  0x5d   :  { %1101 = vmatpush1.bf16.msra.mxu0 %v1709_v6 }
  0x5e   :  { %1102 = vmatprep.subr.bf16.mxu0 %v1711_v8  ;;  %1603 = vmatpush3.bf16.msra.mxu1 %v1720_v15 }
  0x5f   :  { %1604 = vmatprep.subr.bf16.mxu1 %v1723_v3 }
  0x61   :  { %1103 = vmatpush1.bf16.msra.mxu0 %v1714_v10 }
  0x62   :  { %1104 = vmatprep.subr.bf16.mxu0 %v1716_v12  ;;  %1605 = vmatpush3.bf16.msra.mxu1 %v1725_v19  ;;  %v1746_v19 = vld [vmem:[#allocation6 + $0x180] ss:$12 sps:$4 sm:$0xff]  }
  0x63   :  { %1606 = vmatprep.subr.bf16.mxu1 %v1728_v21  ;;  %v1750_v21 = vld [vmem:[#allocation6 + $0x188] ss:$12 sps:$4 sm:$0xff]  }
  0x65   :  { %1105 = vmatpush1.bf16.msra.mxu0 %v1719_v14 }
  0x66   :  { %1106 = vmatprep.subr.bf16.mxu0 %v1721_v17  ;;  %1607 = vmatpush3.bf16.msra.mxu1 %v1730_v23  ;;  %v1754_v23 = vld [vmem:[#allocation6 + $0x260] ss:$12 sps:$4 sm:$0xff]  }
  0x67   :  { %1608 = vmatprep.subr.bf16.mxu1 %v1733_v25  ;;  %v1755_v25 = vld [vmem:[#allocation6 + $0x1a0] ss:$12 sps:$4 sm:$0xff]  }
  0x69   :  { %1107 = vmatpush1.bf16.msra.mxu0 %v1724_v18 }
  0x6a   :  { %1108 = vmatprep.subr.bf16.mxu0 %v1726_v20 }
  0x6d   :  { %1109 = vmatpush1.bf16.msra.mxu0 %v1729_v22  ;;  %v1753_v22 = vld [vmem:[#allocation6 + $0x19c] ss:$12 sps:$4 sm:$0xff]  }
  0x6e   :  { %1110 = vmatprep.subr.bf16.mxu0 %v1731_v24  ;;  %v1751_v24 = vld [vmem:[#allocation6 + $0x198] ss:$12 sps:$4 sm:$0xff]  }
  0x71   :  { %1111 = vmatpush1.bf16.msra.mxu0 %v1734_v26  ;;  %v1758_v26 = vld [vmem:[#allocation6 + $0x1b4] ss:$12 sps:$4 sm:$0xff]  }
 0x110   :  { %v200_v33 = vpop.f32.mrb[0].mxu1 }
 0x111   :  { %v2044_v34 = vadd.f32 %v200_v33, %v94_v31  ;;  %v202_v35 = vpop.f32.mrb[1].mxu1  ;;  %v1735_v31 = vld [vmem:[#allocation6 + $0x80] ss:$12 sps:$4 sm:$0xff]   ;;  %v1738_v33 = vld [vmem:[#allocation6 + $0x158] ss:$12 sps:$4 sm:$0xff]  }
 0x112   :  { %v2049_v37 = vadd.f32 %v202_v35, %v98_v32  ;;  %v204_v38 = vpop.f32.mrb[2].mxu1  ;;  %v1736_v32 = vld [vmem:[#allocation6 + $0x154] ss:$12 sps:$4 sm:$0xff]   ;;  %1609 = vmatpush3.bf16.msra.mxu1 %v1735_v31  ;;  %v1739_v35 = vld [vmem:[#allocation6 + $0x150] ss:$12 sps:$4 sm:$0xff]  }
 0x113   :  { %v205_v40 = vpop.f32.mrb[3].mxu1  ;;  %v339_v41 = vmul.f32 %v2044_v34, %v2044_v34  ;;  %v330_v45 = vsel %vm329_vm1, %v2044_v34, 0.0  ;;  %v1740_v38 = vld [vmem:[#allocation6 + $0x98] ss:$12 sps:$4 sm:$0xff]   ;;  %1112 = vmatprep.subr.bf16.mxu0 %v1736_v32  ;;  %1610 = vmatprep.subr.bf16.mxu1 %v1738_v33  ;;  %v1756_v32 = vld [vmem:[#allocation6 + $0x1b0] ss:$12 sps:$4 sm:$0xff]  }
 0x114   :  { %v340_v42 = vmul.f32 %v2049_v37, %v2049_v37  ;;  %v331_v46 = vsel %vm329_vm1, %v2049_v37, 0.0  ;;  %v1741_v40 = vld [vmem:[#allocation6 + $0x16c] ss:$12 sps:$4 sm:$0xff]   ;;  %1113 = vmatpush1.bf16.msra.mxu0 %v1739_v35 }
 0x115   :  { %v343_v50 = vsel %vm329_vm1, %v339_v41, 0.0  ;;  %v332_v54 = vadd.f32 %v331_v46, %v330_v45  ;;  %v1743_v41 = vld [vmem:[#allocation6 + $0x170] ss:$12 sps:$4 sm:$0xff]   ;;  %1114 = vmatprep.subr.bf16.mxu0 %v1741_v40  ;;  %v1749_v45 = vld [vmem:[#allocation6 + $0x248] ss:$12 sps:$4 sm:$0xff]  }
 0x116   :  { %v344_v51 = vsel %vm329_vm1, %v340_v42, 0.0  ;;  %1611 = vmatpush3.bf16.msra.mxu1 %v1740_v38  ;;  %v1744_v42 = vld [vmem:[#allocation6 + $0x168] ss:$12 sps:$4 sm:$0xff]   ;;  %v1759_v31 = vld [vmem:[#allocation6 + $0x278] ss:$12 sps:$4 sm:$0xff]  }
 0x117   :  { %v345_v61 = vadd.f32 %v344_v51, %v343_v50  ;;  %1612 = vmatprep.subr.bf16.mxu1 %v1743_v41  ;;  %v1760_v33 = vld [vmem:[#allocation6 + $0x1b8] ss:$12 sps:$4 sm:$0xff]   ;;  %v1764_v38 = vld [vmem:[#allocation6 + $0x290] ss:$12 sps:$4 sm:$0xff]   ;;  %v1761_v40 = vld [vmem:[#allocation6 + $0x1c8] ss:$12 sps:$4 sm:$0xff]  }
 0x118   :  { %v241_v47 = vpop.f32.mrb[4].mxu1  ;;  %1115 = vmatpush1.bf16.msra.mxu0 %v1744_v42  ;;  %v1763_v35 = vld [vmem:[#allocation6 + $0x1cc] ss:$12 sps:$4 sm:$0xff]   ;;  %v1765_v41 = vld [vmem:[#allocation6 + $0x1d0] ss:$12 sps:$4 sm:$0xff]  }
 0x119   :  { %v2066_v48 = vadd.f32 %v241_v47, %v102_v43  ;;  %v243_v49 = vpop.f32.mrb[5].mxu1  ;;  %v1745_v43 = vld [vmem:[#allocation6 + $0xb0] ss:$12 sps:$4 sm:$0xff]  }
 0x11a   :  { %v2070_v52 = vadd.f32 %v243_v49, %v106_v44  ;;  %v245_v53 = vpop.f32.mrb[6].mxu1  ;;  %1613 = vmatpush3.bf16.msra.mxu1 %v1745_v43  ;;  %v1748_v44 = vld [vmem:[#allocation6 + $0x184] ss:$12 sps:$4 sm:$0xff]   ;;  %v1769_v43 = vld [vmem:[#allocation6 + $0x2a8] ss:$12 sps:$4 sm:$0xff]  }
 0x11b   :  { %v341_v55 = vmul.f32 %v2066_v48, %v2066_v48  ;;  %v246_v56 = vpop.f32.mrb[7].mxu1  ;;  %v333_v57 = vsel %vm329_vm1, %v2066_v48, 0.0  ;;  %1125 = vmatprep.subr.bf16.mxu0 %v1748_v44  ;;  %1620 = vmatprep.subr.bf16.mxu1 %v1749_v45  ;;  %v1768_v42 = vld [vmem:[#allocation6 + $0x1e4] ss:$12 sps:$4 sm:$0xff]   ;;  %v1766_v45 = vld [vmem:[#allocation6 + $0x1e0] ss:$12 sps:$4 sm:$0xff]  }
 0x11c   :  { %v334_v58 = vadd.f32 %v333_v57, %v332_v54  ;;  %v335_v59 = vsel %vm329_vm1, %v2070_v52, 0.0  ;;  %v342_v60 = vmul.f32 %v2070_v52, %v2070_v52 }
 0x11d   :  { %v346_v62 = vsel %vm329_vm1, %v341_v55, 0.0 }
 0x11e   :  { %v336_v63 = vadd.f32 %v335_v59, %v334_v58  ;;  %v347_v0 = vadd.f32 %v346_v62, %v345_v61  ;;  %v348_v1 = vsel %vm329_vm1, %v342_v60, 0.0  ;;  %v2097_v60 = vld [vmem:[%s2190_s3] sm:$0xf] }
 0x11f   :  { %v2102_v61 = vld [vmem:[%s2191_s4] sm:$0xf]  ;;  %v376_v62 = vrot.slane %v2097_v60, %v2038_v30  ;;  %v384_v4 = vrot.slane %v2097_v60, %v2052_v39 }
 0x120   :  { %337 = vadd.xlane.f32.xlu0 %v336_v63  ;;  %v349_v2 = vadd.f32 %v348_v1, %v347_v0  ;;  %v2086_v46 = vpop.f32.mrb[8].mxu1  ;;  %v372_v63 = vrot.slane %v2097_v60, %v2030_v28  ;;  %v402_v6 = vrot.slane %v2102_v61, %v2038_v30  ;;  %v398_v7 = vrot.slane %v2102_v61, %v2030_v28 }
 0x121   :  { %v2088_v47 = vpop.f32.mrb[9].mxu1 }
 0x122   :  { %v286_v49 = vpop.f32.mrb[10].mxu1 }
 0x123   :  { %v287_v50 = vpop.f32.mrb[11].mxu1  ;;  %v1770_v49 = vld [vmem:[#allocation6 + $0x1e8] ss:$12 sps:$4 sm:$0xff]  }
 0x124   :  { %350 = vadd.xlane.f32.xlu0 %v349_v2  ;;  %v1773_v50 = vld [vmem:[#allocation6 + $0x1fc] ss:$12 sps:$4 sm:$0xff]  }
 0x1ad   :  { %v338_v51 = vpop.xlane.xlu0 %337 }
 0x1ae   :  { %v2090_v53 = vmul.f32 0.0025, %v338_v51  ;;  %v1774_v51 = vld [vmem:[#allocation6 + $0x2c0] ss:$12 sps:$4 sm:$0xff]  }
 0x1b0   :  { %v354_v55 = vmul.f32 %v2090_v53, %v2090_v53  ;;  %v358_v0 = vsub.f32 %v2049_v37, %v2090_v53  ;;  %v357_v1 = vsub.f32 %v2044_v34, %v2090_v53  ;;  %v360_v2 = vsub.f32 %v2070_v52, %v2090_v53 }
 0x1b1   :  { %v351_v54 = vpop.xlane.xlu0 %350  ;;  %v410_v37 = vrot.slane %v2102_v61, %v2052_v39  ;;  %v359_v44 = vsub.f32 %v2066_v48, %v2090_v53  ;;  %v1779_v48 = vld [vmem:[#allocation6 + $0x2d8] ss:$12 sps:$4 sm:$0xff]  }
 0x1b2   :  { %v353_v56 = vmul.f32 0.0025, %v351_v54 }
 0x1b4   :  { %v355_v57 = vsub.f32 %v353_v56, %v354_v55  ;;  %v380_v55 = vrot.slane %v2097_v60, %v2047_v36  ;;  %v1771_v56 = vld [vmem:[#allocation6 + $0x1f8] ss:$12 sps:$4 sm:$0xff]   ;;  %v1784_v60 = vld [vmem:[#allocation6 + $0x2f0] ss:$12 sps:$4 sm:$0xff]  }
 0x1b6   :  { %v356_v58 = vmax.f32 %v355_v57, 0.0  ;;  %v1775_v57 = vld [vmem:[#allocation6 + $0x200] ss:$12 sps:$4 sm:$0xff]  }
 0x1b8   :  { %v361_v59 = vadd.f32 1e-05, %v356_v58  ;;  %v1778_v58 = vld [vmem:[#allocation6 + $0x214] ss:$12 sps:$4 sm:$0xff]  }
 0x1ba   :  { %1810 = vrsqrt.f32 %v361_v59  ;;  %v406_v59 = vrot.slane %v2102_v61, %v2047_v36  ;;  %v1786_v61 = vld [vmem:[#allocation6 + $0x240] ss:$12 sps:$4 sm:$0xff]  }
 0x1c4   :  { %v1811_v5 = vpop.eup %1810 }
 0x1c5   :  { %v364_v8 = vmul.f32 %v1811_v5, %v358_v0  ;;  %v363_v9 = vmul.f32 %v1811_v5, %v357_v1  ;;  %v366_v10 = vmul.f32 %v1811_v5, %v360_v2  ;;  %v365_v54 = vmul.f32 %v1811_v5, %v359_v44  ;;  %v1783_v0 = vld [vmem:[#allocation6 + $0x22c] ss:$12 sps:$4 sm:$0xff]   ;;  %v1781_v2 = vld [vmem:[#allocation6 + $0x228] ss:$12 sps:$4 sm:$0xff]   ;;  %v1788_v5 = vld [vmem:[#allocation6 + $0x244] ss:$12 sps:$4 sm:$0xff]  }
 0x1c7   :  { %v390_v34 = vmul.f32 %v376_v62, %v364_v8  ;;  %v389_v11 = vmul.f32 %v372_v63, %v363_v9  ;;  %v392_v12 = vmul.f32 %v384_v4, %v366_v10  ;;  %v391_v53 = vmul.f32 %v380_v55, %v365_v54  ;;  %v1776_v62 = vld [vmem:[#allocation6 + $0x210] ss:$12 sps:$4 sm:$0xff]   ;;  %v1780_v63 = vld [vmem:[#allocation6 + $0x218] ss:$12 sps:$4 sm:$0xff]   ;;  %v1794_v10 = vld [vmem:[#allocation6 + $0x274] ss:$12 sps:$4 sm:$0xff]  }
 0x1c8   :  { %v1785_v4 = vld [vmem:[#allocation6 + $0x230] ss:$12 sps:$4 sm:$0xff]   ;;  %v1789_v9 = vld [vmem:[#allocation6 + $0x258] ss:$12 sps:$4 sm:$0xff]  }
 0x1c9   :  { %v416_v52 = vadd.f32 %v402_v6, %v390_v34  ;;  %v415_v13 = vadd.f32 %v398_v7, %v389_v11  ;;  %v418_v14 = vadd.f32 %v410_v37, %v392_v12  ;;  %v417_v1 = vadd.f32 %v406_v59, %v391_v53  ;;  %v1791_v8 = vld [vmem:[#allocation6 + $0x25c] ss:$12 sps:$4 sm:$0xff]   ;;  %v1797_v34 = vld [vmem:[#allocation6 + $0x28c] ss:$12 sps:$4 sm:$0xff]   ;;  %v1800_v12 = vld [vmem:[#allocation6 + $0x2a4] ss:$12 sps:$4 sm:$0xff]  }
 0x1ca   :  { %v1792_v37 = vld [vmem:[#allocation6 + $0x270] ss:$12 sps:$4 sm:$0xff]   ;;  %v1795_v11 = vld [vmem:[#allocation6 + $0x288] ss:$12 sps:$4 sm:$0xff]  }
 0x1cb   :  { %v420_v15 = vmax.f32 %v416_v52, 0.0  ;;  %v419_v17 = vmax.f32 %v415_v13, 0.0  ;;  %v422_v3 = vmax.f32 %v418_v14, 0.0  ;;  %v421_v6 = vmax.f32 %v417_v1, 0.0  ;;  %v1798_v52 = vld [vmem:[#allocation6 + $0x2a0] ss:$12 sps:$4 sm:$0xff]  }
 0x1cc   :  { %v1803_v13 = vld [vmem:[#allocation6 + $0x2bc] ss:$12 sps:$4 sm:$0xff]   ;;  %v1801_v14 = vld [vmem:[#allocation6 + $0x2b8] ss:$12 sps:$4 sm:$0xff]  }
 0x1cd   :  { %v424_v18 = vpack.c.bf16 %v420_v15, %v420_v15  ;;  %v423_v20 = vpack.c.bf16 %v419_v17, %v419_v17  ;;  %v426_v39 = vpack.c.bf16 %v422_v3, %v422_v3  ;;  %v425_v7 = vpack.c.bf16 %v421_v6, %v421_v6  ;;  %v1806_v15 = vld [vmem:[#allocation6 + $0x2d4] ss:$12 sps:$4 sm:$0xff]   ;;  %v2128_v17 = vpop.f32.mrb[12].mxu1 }
 0x1ce   :  { %v1648_v3 = vpop.f32.mrb[13].mxu1  ;;  %v1326_v6 = vld [vmem:[%s2196_s9 + $0x8] sm:$0xff] }
 0x1cf   :  { %1116 = vmatprep.mubr.bf16.mxu0 %v424_v18  ;;  %1198 = vmatprep.mubr.bf16.mxu1 %v424_v18  ;;  %v1804_v18 = vld [vmem:[#allocation6 + $0x2d0] ss:$12 sps:$4 sm:$0xff]   ;;  %v117_v3 = vsub.s32 6, %v2027_v27 }
 0x1d0   :  { %1117 = vmatmul.mubr.bf16.vlgmr.msra.gmra.mrb[0].mxu0 %v423_v20  ;;  %1199 = vmatmul.mubr.bf16.vlgmr.msra.gmra.mrb[16].mxu1 %v423_v20  ;;  %v1809_v20 = vld [vmem:[#allocation6 + $0x2ec] ss:$12 sps:$4 sm:$0xff]  }
 0x1d1   :  { %1126 = vmatpush1.bf16.msra.mxu0 %v1746_v19  ;;  %1621 = vmatpush3.bf16.msra.mxu1 %v1750_v21  ;;  %v326_v19 = vpop.f32.mrb[14].mxu1 }
 0x1d2   :  { %1157 = vmatprep.mubr.bf16.mxu0 %v426_v39  ;;  %1238 = vmatprep.mubr.bf16.mxu1 %v426_v39  ;;  %v1649_v21 = vpop.f32.mrb[15].mxu1 }
 0x1d3   :  { %1127 = vmatprep.subr.bf16.mxu0 %v1753_v22  ;;  %1622 = vmatprep.subr.bf16.mxu1 %v1754_v23  ;;  %v1807_v22 = vld [vmem:[#allocation6 + $0x2e8] ss:$12 sps:$4 sm:$0xff]  }
 0x1d5   :  { %1128 = vmatpush1.bf16.msra.mxu0 %v1751_v24  ;;  %1623 = vmatpush3.bf16.msra.mxu1 %v1755_v25 }
 0x1d6   :  { %1129 = vmatprep.subr.bf16.mxu0 %v1758_v26  ;;  %1624 = vmatprep.subr.bf16.mxu1 %v1759_v31  ;;  %v555_v31 = vld [vmem:[%s2193_s6] sm:$0x7] }
 0x1d7   :  { %v560_v44 = vrot.slane %v555_v31, %v2030_v28 }
 0x1d9   :  { %1130 = vmatpush1.bf16.msra.mxu0 %v1756_v32  ;;  %1625 = vmatpush3.bf16.msra.mxu1 %v1760_v33  ;;  %v568_v32 = vrot.slane %v555_v31, %v2047_v36 }
 0x1da   :  { %1131 = vmatprep.subr.bf16.mxu0 %v1763_v35  ;;  %1626 = vmatprep.subr.bf16.mxu1 %v1764_v38 }
 0x1dd   :  { %1132 = vmatpush1.bf16.msra.mxu0 %v1761_v40  ;;  %1627 = vmatpush3.bf16.msra.mxu1 %v1765_v41 }
 0x1de   :  { %1133 = vmatprep.subr.bf16.mxu0 %v1768_v42  ;;  %1628 = vmatprep.subr.bf16.mxu1 %v1769_v43 }
 0x1e1   :  { %1134 = vmatpush1.bf16.msra.mxu0 %v1766_v45  ;;  %1629 = vmatpush3.bf16.msra.mxu1 %v1770_v49  ;;  %v564_v45 = vrot.slane %v555_v31, %v2038_v30 }
 0x1e2   :  { %1135 = vmatprep.subr.bf16.mxu0 %v1773_v50  ;;  %1630 = vmatprep.subr.bf16.mxu1 %v1774_v51 }
 0x1e5   :  { %1136 = vmatpush1.bf16.msra.mxu0 %v1771_v56  ;;  %1631 = vmatpush3.bf16.msra.mxu1 %v1775_v57 }
 0x1e6   :  { %1137 = vmatprep.subr.bf16.mxu0 %v1778_v58  ;;  %1632 = vmatprep.subr.bf16.mxu1 %v1779_v48 }
 0x1e9   :  { %1138 = vmatpush1.bf16.msra.mxu0 %v1776_v62  ;;  %1633 = vmatpush3.bf16.msra.mxu1 %v1780_v63 }
 0x1ea   :  { %1139 = vmatprep.subr.bf16.mxu0 %v1783_v0  ;;  %1634 = vmatprep.subr.bf16.mxu1 %v1784_v60 }
 0x1ed   :  { %1140 = vmatpush1.bf16.msra.mxu0 %v1781_v2  ;;  %1635 = vmatpush3.bf16.msra.mxu1 %v1785_v4 }
 0x1ee   :  { %1141 = vmatprep.subr.bf16.mxu0 %v1788_v5 }
 0x1f0   :  { %1239 = vmatmul.mubr.bf16.vlgmr.msra.gmra.mrb[20].mxu1 %v425_v7 }
 0x1f1   :  { %1142 = vmatpush1.bf16.msra.mxu0 %v1786_v61  ;;  %1392 = vmatprep.mubr.f32.mxu1 %v1326_v6 }
 0x1f2   :  { %1143 = vmatprep.subr.bf16.mxu0 %v1791_v8 }
 0x1f5   :  { %1144 = vmatpush1.bf16.msra.mxu0 %v1789_v9 }
 0x1f6   :  { %1145 = vmatprep.subr.bf16.mxu0 %v1794_v10 }
 0x1f9   :  { %1146 = vmatpush1.bf16.msra.mxu0 %v1792_v37 }
 0x1fa   :  { %1147 = vmatprep.subr.bf16.mxu0 %v1797_v34 }
 0x1fd   :  { %1148 = vmatpush1.bf16.msra.mxu0 %v1795_v11 }
 0x1fe   :  { %1149 = vmatprep.subr.bf16.mxu0 %v1800_v12  ;;  %v109_v12 = vsub.s32 4, %v2027_v27 }
 0x201   :  { %1150 = vmatpush1.bf16.msra.mxu0 %v1798_v52  ;;  %v113_v52 = vsub.s32 5, %v2027_v27  ;;  %v118_v27 = vrot.slane %v2035_v29, %v117_v3 }
 0x202   :  { %1151 = vmatprep.subr.bf16.mxu0 %v1803_v13  ;;  %v1276_v13 = vld [vmem:[#allocation8] sm:$0x7] }
 0x203   :  { %v1285_v19 = vrot.slane %v1276_v13, %v2038_v30 }
 0x205   :  { %1152 = vmatpush1.bf16.msra.mxu0 %v1801_v14  ;;  %v110_v14 = vrot.slane %v2035_v29, %v109_v12 }
 0x206   :  { %1153 = vmatprep.subr.bf16.mxu0 %v1806_v15  ;;  %v114_v15 = vrot.slane %v2035_v29, %v113_v52 }
 0x209   :  { %1154 = vmatpush1.bf16.msra.mxu0 %v1804_v18  ;;  %v1296_v18 = vld [vmem:[%s2195_s8] sm:$0x7] }
 0x20a   :  { %1155 = vmatprep.subr.bf16.mxu0 %v1809_v20  ;;  %v1281_v20 = vrot.slane %v1276_v13, %v2030_v28  ;;  %v1305_v31 = vrot.slane %v1296_v18, %v2038_v30 }
 0x20d   :  { %1156 = vmatpush1.bf16.msra.mxu0 %v1807_v22 }
 0x210   :  { %1158 = vmatmul.mubr.bf16.vlgmr.msra.gmra.mrb[0].mxu0 %v425_v7 }
 0x2a3   :  { %v1614_v23 = vpop.f32.mrb[16].mxu1 }
 0x2a4   :  { %v1615_v39 = vpop.f32.mrb[17].mxu1 }
 0x2a5   :  { %v1616_v24 = vadd.f32 %v1615_v39, %v1614_v23  ;;  %v1617_v25 = vpop.f32.mrb[18].mxu1  ;;  %v1289_v39 = vrot.slane %v1276_v13, %v2047_v36 }
 0x2a6   :  { %v1618_v26 = vpop.f32.mrb[19].mxu1  ;;  %v283_v25 = vadd.f32 %v2086_v46, %v110_v14 }
 0x2a7   :  { %v1201_v38 = vadd.f32 %v1616_v24, %v568_v32  ;;  %v285_v26 = vadd.f32 %v2088_v47, %v114_v15 }
 0x2a9   :  { %v1317_v46 = vmax.f32 %v285_v26, 0.0 }
 0x2c3   :  { %v1636_v33 = vpop.f32.mrb[20].mxu1 }
 0x2c4   :  { %v1637_v35 = vpop.f32.mrb[21].mxu1 }
 0x2c5   :  { %v1638_v40 = vadd.f32 %v1637_v35, %v1636_v33  ;;  %v1639_v41 = vpop.f32.mrb[22].mxu1  ;;  %v1301_v35 = vrot.slane %v1296_v18, %v2030_v28  ;;  %v1325_v28 = vld [vmem:[%s2196_s9] sm:$0xff] }
 0x2c6   :  { %v1640_v42 = vpop.f32.mrb[23].mxu1 }
 0x2c7   :  { %v1241_v43 = vadd.f32 %v1638_v40, %v1201_v38  ;;  %v1309_v40 = vrot.slane %v1296_v18, %v2047_v36 }
 0x2c9   :  { %v1249_v63 = vsel %vm329_vm1, %v1241_v43, 0.0  ;;  %v1255_v0 = vmul.f32 %v1241_v43, %v1241_v43 }
 0x2cb   :  { %v1259_v4 = vsel %vm329_vm1, %v1255_v0, 0.0 }
 0x2e3   :  { %v1159_v49 = vpop.f32.mrb[0].mxu0 }
 0x2e4   :  { %v1655_v50 = vadd.f32 %v1159_v49, %v560_v44  ;;  %v1161_v51 = vpop.f32.mrb[1].mxu0  ;;  %v324_v44 = vadd.f32 %v2128_v17, %v118_v27  ;;  %v1327_v17 = vld [vmem:[%s2196_s9 + $0x10] sm:$0xff] }
 0x2e5   :  { %v1656_v54 = vadd.f32 %v1161_v51, %v564_v45  ;;  %v1163_v55 = vpop.f32.mrb[2].mxu0  ;;  %v1316_v45 = vmax.f32 %v283_v25, 0.0 }
 0x2e6   :  { %v1253_v56 = vmul.f32 %v1655_v50, %v1655_v50  ;;  %v1164_v57 = vpop.f32.mrb[3].mxu0  ;;  %v1246_v58 = vsel %vm329_vm1, %v1655_v50, 0.0  ;;  %v1318_v30 = vmax.f32 %v324_v44, 0.0 }
 0x2e7   :  { %v1254_v48 = vmul.f32 %v1656_v54, %v1656_v54  ;;  %v1247_v53 = vsel %vm329_vm1, %v1656_v54, 0.0 }
 0x2e8   :  { %v1248_v59 = vadd.f32 %v1247_v53, %v1246_v58  ;;  %v1256_v62 = vsel %vm329_vm1, %v1253_v56, 0.0  ;;  %v1469_v53 = vstv %s2197_s10 }
 0x2e9   :  { %v1257_v60 = vsel %vm329_vm1, %v1254_v48, 0.0 }
 0x2ea   :  { %v1250_v1 = vadd.f32 %v1249_v63, %v1248_v59  ;;  %v1258_v2 = vadd.f32 %v1257_v60, %v1256_v62 }
 0x2ec   :  { %1251 = vadd.xlane.f32.xlu1 %v1250_v1  ;;  %v1260_v5 = vadd.f32 %v1259_v4, %v1258_v2 }
 0x2f0   :  { %1261 = vadd.xlane.f32.xlu1 %v1260_v5 }
 0x379   :  { %v1252_v61 = vpop.xlane.xlu1 %1251 }
 0x37a   :  { %v1263_v7 = vmul.f32 0.0033333334, %v1252_v61 }
 0x37c   :  { %v1265_v9 = vmul.f32 %v1263_v7, %v1263_v7  ;;  %v1268_v21 = vsub.f32 %v1655_v50, %v1263_v7  ;;  %v1269_v22 = vsub.f32 %v1656_v54, %v1263_v7  ;;  %v1270_v23 = vsub.f32 %v1241_v43, %v1263_v7 }
 0x37d   :  { %v1262_v8 = vpop.xlane.xlu1 %1261 }
 0x37e   :  { %v1264_v10 = vmul.f32 0.0033333334, %v1262_v8 }
 0x380   :  { %v1266_v37 = vsub.f32 %v1264_v10, %v1265_v9 }
 0x382   :  { %v1267_v34 = vmax.f32 %v1266_v37, 0.0 }
 0x384   :  { %v1271_v11 = vadd.f32 1e-05, %v1267_v34 }
 0x386   :  { %1812 = vrsqrt.f32 %v1271_v11 }
 0x390   :  { %v1813_v24 = vpop.eup %1812 }
 0x391   :  { %v1274_v32 = vmul.f32 %v1813_v24, %v1269_v22  ;;  %v1273_v33 = vmul.f32 %v1813_v24, %v1268_v21  ;;  %v1275_v38 = vmul.f32 %v1813_v24, %v1270_v23 }
 0x393   :  { %v1294_v41 = vmul.f32 %v1285_v19, %v1274_v32  ;;  %v1293_v42 = vmul.f32 %v1281_v20, %v1273_v33  ;;  %v1295_v43 = vmul.f32 %v1289_v39, %v1275_v38 }
 0x395   :  { %v1314_v49 = vadd.f32 %v1305_v31, %v1294_v41  ;;  %v1313_v47 = vadd.f32 %v1301_v35, %v1293_v42  ;;  %v1315_v50 = vadd.f32 %v1309_v40, %v1295_v43 }
 0x397   :  { %v1320_v29 = vadd.f32 %v1317_v46, %v1314_v49  ;;  %v1319_v51 = vadd.f32 %v1316_v45, %v1313_v47  ;;  %v1321_v56 = vadd.f32 %v1318_v30, %v1315_v50 }
 0x399   :  { %v1323_v54 = vmax.f32 %v1320_v29, 0.0  ;;  %v1322_v55 = vmax.f32 %v1319_v51, 0.0  ;;  %v1324_v36 = vmax.f32 %v1321_v56, 0.0 }
 0x39b   :  { %1328 = vmatprep.subr.mxu1 %v1323_v54 }
 0x39c   :  { %1329 = vmatpush1.xpose.msra.mxu1 %v1322_v55 }
 0x39d   :  { %1650 = vmatprep.subr.mxu1 %v1916_v16 }
 0x39f   :  { %1393 = vmatmul.mubr.f32.vlgmr.msra.gmra.mrb[24].mxu1 %v1325_v28 }
 0x3a0   :  { %1651 = vmatpush3.xpose.msra.mxu1 %v1324_v36  ;;  %1652 = vmatprep.mubr.msk.f32.mxu1 %vm1917_vm2, %v1916_v16 }
 0x3a3   :  { %1653 = vmatmul.mubr.f32.vlgmr.msra.gmra.mrb[26].mxu1 %v1327_v17 }
 0x472   :  { %v1394_v57 = vpop.f32.mrb[24].mxu1 }
 0x473   :  { %v1396_v58 = vpop.f32.mrb[25].mxu1 }
 0x476   :  { %v1464_v48 = vpop.f32.mrb[26].mxu1 }
 0x477   :  { %v1465_v59 = vadd.f32 %v1464_v48, %v1394_v57  ;;  %v1654_v62 = vpop.f32.mrb[27].mxu1 }
 0x479   :  { %v1470_v63 = vadd.f32 %v1469_v53, %v1465_v59 }
 0x47b   :  { %1472 = vst.msk [vmem:[#allocation9] sm:$0x1] %vm1471_vm3, %v1470_v63 }
 0x47c   :  { %1891 = shalt.err (!%p1888_p0)
}
 0x47d   :  { %s1892_s10 = scalar_lea.hbm %s2198_s11, 16 }
 0x47e   :  { %p1893_p1 = scmp.ne.s32.totalorder %s2198_s11, %s1892_s10  ;;  %p1896_p2 = scmp.lt.u32.totalorder %s1892_s10, %s2198_s11 }
 0x480   :  { %p1898_p3 = pnand %p1896_p2, %p1893_p1 }
 0x482   :  { %1901 = shalt.err (!%p1898_p3)
}
 0x483   :  { %1482 = dma.vmem_to_hbm [thread:$0]  %s1480_s12, 16, %s2198_s11, [#allocation5]  }
 0x484   :  { %1906 = dma.done.wait [#allocation5], 16  }
 0x485   :  { %1907 = vsyncadd [#allocation5], 4294967280 }
 0x486   :  { %1486 = vsyncpa [#allocation4], 1 }
 0x487   :  { %1487 = vsyncpa [#allocation7], 1 }
 0x488   :  { %1488 = vsyncpa [#allocation5], 1 }

</bundles_post_ra>
